<compile_context>
chip_gen: v5e
topology: v5e:2x2
jax: 0.10.0
libtpu: 0.0.40
codegen_flags: <defaults>
</compile_context>

<pallas_src>
import functools

import jax
import jax.numpy as jnp
from jax.experimental import pallas as pl
from jax.experimental.pallas import tpu as pltpu


_LANE = 128
_TARGET_BLOCK_BYTES = 4 * 1024 * 1024     # ~4 MiB row tiles (v6e sweet spot, fine on v5e/v7x)
_SMALL_COPY_BYTES = 256 * 1024            # below this, a plain XLA copy is cheaper
_MIN_GRID_STEPS = 4                       # shard large copies across v7x's 2 TensorCores
_VMEM_LIMIT_BYTES = 32 * 1024 * 1024      # double-buffered in+out 4 MiB tiles ≈ 16 MiB


def _copy_kernel(x_ref, o_ref):
    # Straight VMEM tile pass-through: lane-dense, unmasked full-width stores.
    o_ref[...] = x_ref[...]


def _round_up(x, m):
    return ((x + m - 1) // m) * m


@functools.partial(jax.jit, static_argnames=("tile_rows",))
def _pallas_copy_flat128(x2d, *, tile_rows):
    """Copy a lane-dense (rows, 128) array with a tiled Pallas kernel."""
    rows, lanes = x2d.shape
    return pl.pallas_call(
        _copy_kernel,
        out_shape=jax.ShapeDtypeStruct((rows, lanes), x2d.dtype),
        grid=(pl.cdiv(rows, tile_rows),),
        in_specs=[pl.BlockSpec((tile_rows, lanes), lambda r: (r, 0))],
        out_specs=pl.BlockSpec((tile_rows, lanes), lambda r: (r, 0)),
        compiler_params=pltpu.CompilerParams(
            dimension_semantics=("parallel",),
            vmem_limit_bytes=_VMEM_LIMIT_BYTES,
        ),
    )(x2d)


def _choose_tile_rows(rows, itemsize):
    """Row-tile size: big enough to amortize per-step overhead, small enough to
    give >= _MIN_GRID_STEPS parallel grid steps on large copies (v7x 2-TC sharding)."""
    # Minimum sublane granularity for packed sub-32-bit dtypes (f32->8, bf16->16, int8->32).
    min_sublane = 8 * max(1, 4 // itemsize)
    if rows <= min_sublane:
        # Single block equal to the full array dims (always a legal block shape).
        return rows
    target_rows = max(min_sublane, _TARGET_BLOCK_BYTES // (_LANE * itemsize))
    tile_rows = min(target_rows, _round_up(rows, min_sublane))
    if rows >= _MIN_GRID_STEPS * min_sublane:
        per_step = _round_up(pl.cdiv(rows, _MIN_GRID_STEPS), min_sublane)
        tile_rows = min(tile_rows, per_step)
    # Keep the block sublane-aligned so (tile_rows, 128) satisfies the (8,128) rule.
    tile_rows = max(min_sublane, (tile_rows // min_sublane) * min_sublane)
    return tile_rows


def _materialized_identity_copy(x, *, force_pallas=False):
    """Return a physically distinct copy of `x` (HBM-roofline tuned)."""
    if x.size == 0:
        return jnp.copy(x)

    total = int(x.size)
    itemsize = jnp.dtype(x.dtype).itemsize

    # Tiny tensors: fixed pallas_call/Mosaic overhead dwarfs a sub-vreg copy.
    if not force_pallas and x.nbytes < _SMALL_COPY_BYTES:
        return jnp.copy(x)

    # Non-multiple-of-128 element counts: avoid an extra pad + slice HBM pass;
    # a plain XLA copy is already at the HBM roofline for a memcpy.
    if total % _LANE != 0:
        return jnp.copy(x)

    rows = total // _LANE
    tile_rows = _choose_tile_rows(rows, itemsize)

    # Pure bitcast reshape of a contiguous array -> lane-dense 2D view.
    x2d = x.reshape(rows, _LANE)
    out2d = _pallas_copy_flat128(x2d, tile_rows=tile_rows)
    return out2d.reshape(x.shape)


def news_encoder_forward(title_gpt_embedding, body_gpt_embedding=None, *,
                         materialize=False, force_pallas=False):
    """Pallas/JAX implementation of NewsEncoder.forward.

    The reference module performs no computation, so the default path returns
    the input unchanged (zero HBM traffic, zero kernel-launch overhead).
    Set materialize=True only if a physically distinct output buffer is
    required; that path runs the tuned Pallas copy kernel above.
    """
    del body_gpt_embedding  # unused, exactly as in the reference module
    if not materialize:
        return title_gpt_embedding
    return _materialized_identity_copy(title_gpt_embedding, force_pallas=force_pallas)


if __name__ == "__main__":
    key = jax.random.PRNGKey(0)
    k_title, k_body, k_big = jax.random.split(key, 3)

    # Small shapes consistent with the module's forward signature:
    # batch=2, title sequence=8, GPT hidden=32.
    B, S, D = 2, 8, 32
    title_gpt_embedding = jax.random.normal(k_title, (B, S, D), dtype=jnp.float32)
    body_gpt_embedding = jax.random.normal(k_body, (B, S, D), dtype=jnp.float32)

    # Primary (recommended) path: identity, no kernel launch at all.
    out = news_encoder_forward(title_gpt_embedding, body_gpt_embedding)
    out = jax.block_until_ready(out)
    assert out.shape == title_gpt_embedding.shape
    assert out.dtype == title_gpt_embedding.dtype
    assert bool(jnp.all(out == title_gpt_embedding))

    # Materialized-copy path on the module's shape: force the Pallas kernel
    # (single full-array block, rows=4, lanes=128) and verify bit-exactness.
    out_copy = news_encoder_forward(title_gpt_embedding, body_gpt_embedding,
                                    materialize=True, force_pallas=True)
    out_copy = jax.block_until_ready(out_copy)
    assert out_copy.shape == title_gpt_embedding.shape
    assert out_copy.dtype == title_gpt_embedding.dtype
    assert bool(jnp.all(out_copy == title_gpt_embedding))

    # A slightly larger input to exercise the multi-step "parallel" grid
    # (rows=256 -> 4 grid steps) while staying small.
    x_big = jax.random.normal(k_big, (4, 64, 128), dtype=jnp.float32)
    out_big = news_encoder_forward(x_big, materialize=True, force_pallas=True)
    out_big = jax.block_until_ready(out_big)
    assert out_big.shape == x_big.shape
    assert out_big.dtype == x_big.dtype
    assert bool(jnp.all(out_big == x_big))

    print("KERNEL_OK")
</pallas_src>

<mosaic_0001>
module attributes {stable_mosaic.version = 11 : i64} {
  func.func @_copy_kernel(%arg0: i32, %arg1: memref<4x128xf32, #tpu.memory_space<vmem>>, %arg2: memref<4x128xf32, #tpu.memory_space<vmem>>) attributes {dimension_semantics = [#tpu.dimension_semantics<parallel>], iteration_bounds = array<i64: 1>, scalar_prefetch = 0 : i64, scratch_operands = 0 : i64, tpu.core_type = #tpu.core_type<tc>, window_params = [{transform_indices = @transform_0, window_bounds = array<i64: 4, 128>}, {transform_indices = @transform_1, window_bounds = array<i64: 4, 128>}]} {
    %c0 = arith.constant 0 : index
    %c0_0 = arith.constant 0 : index
    %0 = vector.load %arg1[%c0, %c0_0] : memref<4x128xf32, #tpu.memory_space<vmem>>, vector<4x128xf32>
    %c0_1 = arith.constant 0 : index
    %c0_2 = arith.constant 0 : index
    %1 = vector.load %arg2[%c0_1, %c0_2] : memref<4x128xf32, #tpu.memory_space<vmem>>, vector<4x128xf32>
    tpu.vector_store %arg2[%c0_1, %c0_2], %0 {strides = array<i32>} : memref<4x128xf32, #tpu.memory_space<vmem>>, vector<4x128xf32>,
    return
  }
  func.func @transform_0(%arg0: i32) -> (i32, i32) {
    %c0_i32 = arith.constant 0 : i32
    %c0_i32_0 = arith.constant 0 : i32
    return %arg0, %c0_i32 : i32, i32
  }
  func.func @transform_1(%arg0: i32) -> (i32, i32) {
    %c0_i32 = arith.constant 0 : i32
    %c0_i32_0 = arith.constant 0 : i32
    return %arg0, %c0_i32 : i32, i32
  }
}

</mosaic_0001>

<bundles_post_ra>
// kernel: _pallas_copy_flat128.1
= control target key start
LH: loop header
LB: loop body
LE: loop exit
PB: predicated region body
PF: predicated region fallthrough
CT: control target
= control target key end

     0   :  { %6 = vsyncpa [#allocation3], 0  ;;  %s114_s0 = inlined_call_operand.hbm [shape: f32[4,128], index: 0, kind: input, shape index: {}]   ;;  %s115_s1 = inlined_call_operand.hbm [shape: f32[4,128], index: 1, kind: output, shape index: {}]  }
   0x1   :  { %7 = vsyncpa [#allocation4], 0  ;;  %s13_s8 = sshll.u32 %s114_s0, 4  ;;  %s96_s9 = smov [#allocation2]   ;;  %s14_s8 = int_to_ptr.hbm [resolvable:$true] %s13_s8 }
   0x2   :  { %s15_s10 = sshll.u32 %s96_s9, 4  ;;  %s16_s10 = int_to_ptr.vmem [resolvable:$true] %s15_s10 }
   0x3   :  { %18 = dma.hbm_to_vmem [thread:$0]  %s14_s8, 64, %s16_s10, [#allocation3]  }
   0x4   :  { %92 = dma.done.wait [#allocation3], 64  }
   0x5   :  { %93 = vsyncadd [#allocation3], 4294967232  ;;  %s97_s11 = smov [#allocation5]   ;;  %s32_s15 = sshll.u32 %s115_s1, 4  ;;  %v23_v0 = vld [vmem:[#allocation2] sm:$0xf]  ;;  %s33_s15 = int_to_ptr.hbm [resolvable:$true] %s32_s15 }
   0x6   :  { %s30_s12 = sshll.u32 %s97_s11, 4  ;;  %24 = vst [vmem:[#allocation5] sm:$0xf] %v23_v0  ;;  %s31_s12 = int_to_ptr.vmem [resolvable:$true] %s30_s12 }
   0x7   :  { %35 = dma.vmem_to_hbm [thread:$0]  %s31_s12, 64, %s33_s15, [#allocation4]  }
   0x8   :  { %94 = dma.done.wait [#allocation4], 64  }
   0x9   :  { %95 = vsyncadd [#allocation4], 4294967232 }
   0xa   :  { %40 = vsyncpa [#allocation3], 1 }
   0xb   :  { %41 = vsyncpa [#allocation4], 1 }

</bundles_post_ra>
